<compile_context>
chip_gen: v6e
topology: v6e:2x2x1
jax: 0.10.0
libtpu: 0.0.40
codegen_flags: <defaults>
</compile_context>

<pallas_src>
import functools

import jax
import jax.numpy as jnp
from jax import lax
from jax.experimental import pallas as pl
from jax.experimental.pallas import tpu as pltpu


def _js_kernel(p_ref, q_ref, o_ref, acc_ref, *,
               n_total, tile_n, n_tiles, tiles_per_core,
               inv_t, scale, needs_range_check, needs_mask):
    par = pl.program_id(0)       # parallel (megacore) axis
    tl = pl.program_id(1)        # reduction axis (arbitrary, last in grid)
    idx = par * tiles_per_core + tl

    @pl.when(tl == 0)
    def _():
        acc_ref[...] = jnp.zeros_like(acc_ref)

    c = acc_ref.shape[-1]

    def _fold(x):
        # Fold the (tile_n, C) tile into the (8, C) accumulator with VPU-only
        # adds (sum over the leading axis of (tile_n//8, 8, C) is vreg adds).
        acc_ref[...] += jnp.sum(x.reshape(tile_n // 8, 8, c), axis=0)

    def _compute_and_accumulate():
        eps = jnp.float32(1e-10)
        p_logits = p_ref[...].astype(jnp.float32) * inv_t
        q_logits = q_ref[...].astype(jnp.float32) * inv_t

        def _softmax_eps(x):
            # numerically stable softmax over the class (lane) axis + epsilon
            x = x - jnp.max(x, axis=-1, keepdims=True)
            e = jnp.exp(x)
            inv_s = 1.0 / jnp.sum(e, axis=-1, keepdims=True)  # per-row recip
            return e * inv_s + eps                            # per-elem mult

        p_soft = _softmax_eps(p_logits)
        q_soft = _softmax_eps(q_logits)
        m = 0.5 * (p_soft + q_soft)
        # 0.5*(m*(log m - log p) + m*(log m - log q))
        #   == m*(log m - 0.5*(log p + log q))
        #   == m*log(m * rsqrt(p*q))          (4 EUP ops/elem instead of 5;
        #                                      p*q >= 1e-20, no underflow)
        contrib = m * jnp.log(m * lax.rsqrt(p_soft * q_soft))

        if needs_mask:
            is_tail = idx == (n_tiles - 1)

            @pl.when(jnp.logical_not(is_tail))
            def _():
                _fold(contrib)

            @pl.when(is_tail)
            def _():
                # (tile_n, 1) mask, broadcast in the select.  Select (not
                # multiply) so NaN/Inf from unspecified padding rows cannot
                # leak into the accumulator.
                start_row = idx * tile_n
                row_ids = start_row + lax.broadcasted_iota(
                    jnp.int32, (tile_n, 1), 0)
                _fold(jnp.where(row_ids < n_total, contrib, 0.0))
        else:
            _fold(contrib)

    if needs_range_check:
        # Skip the whole tile of EUP work on clamped out-of-range tiles.
        pl.when(idx < n_tiles)(_compute_and_accumulate)
    else:
        _compute_and_accumulate()

    @pl.when(tl == pl.num_programs(1) - 1)
    def _():
        # Single cross-lane/cross-sublane reduce, once per parallel slice.
        total = jnp.sum(acc_ref[...], axis=(0, 1), keepdims=True)   # (1, 1)
        o_ref[...] = total * jnp.float32(scale)


def _detect_num_cores():
    """TensorCores per chip (2 on v7x, 1 on v5e/v6e); conservative default 1."""
    try:
        info = pltpu.get_tpu_info()
    except Exception:
        return 1
    for attr in ("num_cores", "num_tensorcores", "tensorcores_per_chip",
                 "cores_per_chip", "core_count"):
        v = getattr(info, attr, None)
        if isinstance(v, int) and v > 0:
            return min(v, 2)
    return 1


def js_div_loss(p, q, temperature, *, tile_n=None, num_cores=None):
    """JS divergence loss matching the PyTorch JSDivLoss.forward semantics.

    `temperature` is baked in as a compile-time constant (a Python scalar,
    as in the reference module's call signature).
    """
    assert p.shape == q.shape and p.ndim == 2
    n, c = p.shape
    t = float(temperature)

    if tile_n is None:
        # Target ~2 MiB per input block: per step that is 2 inputs x 2
        # pipeline buffers (~8 MiB) plus ~6x block of fused-body temporaries,
        # all well inside v7x's 64 MiB VMEM, while each step carries >> 0.35us
        # of EUP work so the pipeline overhead stays amortized.
        target_bytes = 2 * 1024 * 1024
        tile_n = max(8, target_bytes // (c * 4))
        n_padded = ((n + 7) // 8) * 8
        tile_n = min(tile_n, n_padded)
        tile_n = max(8, (tile_n // 8) * 8)
    assert tile_n % 8 == 0, "tile_n must be a multiple of 8 (sublane count)"

    n_tiles = pl.cdiv(n, tile_n)
    if num_cores is None:
        num_cores = _detect_num_cores()          # 2 only on multi-TC chips
    n_par = max(1, min(num_cores, n_tiles))      # parallel (megacore) axis
    tiles_per_core = pl.cdiv(n_tiles, n_par)

    kernel = functools.partial(
        _js_kernel,
        n_total=n,
        tile_n=tile_n,
        n_tiles=n_tiles,
        tiles_per_core=tiles_per_core,
        inv_t=1.0 / t,
        scale=(t * t) / n,
        needs_range_check=(n_par * tiles_per_core) != n_tiles,
        needs_mask=(n % tile_n) != 0,
    )

    def in_map(par, tl):
        idx = par * tiles_per_core + tl
        # Clamp out-of-range tiles onto a valid block; their compute is
        # skipped inside the kernel.
        return (jnp.minimum(idx, n_tiles - 1), 0)

    block_bytes = tile_n * c * 4
    acc_bytes = 8 * c * 4
    # 2 inputs x 2 pipeline buffers (4x block) + ~6x block of in-kernel
    # temporaries (shifted logits, exp, softmax x2, m, contrib) + accumulator
    # + slack; capped for v7x's 64 MiB per-TC VMEM.
    vmem_limit = int(min(48 << 20,
                         max(8 << 20, 10 * block_bytes + acc_bytes + (4 << 20))))

    out = pl.pallas_call(
        kernel,
        out_shape=jax.ShapeDtypeStruct((n_par, 1), jnp.float32),
        grid_spec=pltpu.PrefetchScalarGridSpec(
            num_scalar_prefetch=0,
            grid=(n_par, tiles_per_core),
            in_specs=[
                pl.BlockSpec((tile_n, c), in_map),
                pl.BlockSpec((tile_n, c), in_map),
            ],
            out_specs=pl.BlockSpec((1, 1), lambda par, tl: (par, 0)),
            scratch_shapes=[pltpu.VMEM((8, c), jnp.float32)],
        ),
        compiler_params=pltpu.CompilerParams(
            dimension_semantics=("parallel", "arbitrary"),
            vmem_limit_bytes=vmem_limit,
        ),
    )(p, q)
    # Sum the per-TensorCore partial losses (n_par is 1 on v5e/v6e).
    return jnp.sum(out)


def _js_div_loss_ref(p, q, temperature):
    eps = 1e-10
    p = jax.nn.softmax(p / temperature, axis=1) + eps
    q = jax.nn.softmax(q / temperature, axis=1) + eps
    m = 0.5 * (p + q)
    n = p.shape[0]
    kl_p_m = jnp.sum(m * (jnp.log(m) - jnp.log(p))) / n
    kl_q_m = jnp.sum(m * (jnp.log(m) - jnp.log(q))) / n
    return 0.5 * (kl_p_m + kl_q_m) * temperature ** 2


if __name__ == "__main__":
    key = jax.random.PRNGKey(0)
    kp, kq = jax.random.split(key)

    N, C = 16, 128          # batch x classes (logits)
    temperature = 2.0

    p = jax.random.normal(kp, (N, C), dtype=jnp.float32)
    q = jax.random.normal(kq, (N, C), dtype=jnp.float32)

    js = js_div_loss(p, q, temperature)
    js = jax.block_until_ready(js)

    ref = _js_div_loss_ref(p, q, temperature)
    # Reciprocal-multiply softmax, the rsqrt identity, and tile-wise
    # accumulation order differ from the reference at the ~1e-6 level.
    assert jnp.allclose(js, ref, rtol=1e-4, atol=1e-6), (js, ref)

    print("KERNEL_OK")
</pallas_src>

<mosaic_0001>
module attributes {stable_mosaic.version = 11 : i64} {
  func.func @_js_kernel(%arg0: i32, %arg1: i32, %arg2: memref<16x128xf32, #tpu.memory_space<vmem>>, %arg3: memref<16x128xf32, #tpu.memory_space<vmem>>, %arg4: memref<1x1xf32, #tpu.memory_space<vmem>>, %arg5: memref<8x128xf32, #tpu.memory_space<vmem>>) attributes {dimension_semantics = [#tpu.dimension_semantics<parallel>, #tpu.dimension_semantics<arbitrary>], iteration_bounds = array<i64: 1, 1>, scalar_prefetch = 0 : i64, scratch_operands = 1 : i64, tpu.core_type = #tpu.core_type<tc>, window_params = [{transform_indices = @transform_0, window_bounds = array<i64: 16, 128>}, {transform_indices = @transform_1, window_bounds = array<i64: 16, 128>}, {transform_indices = @transform_2, window_bounds = array<i64: 1, 1>}]} {
    %c0_i32 = arith.constant 0 : i32
    %0 = arith.cmpi eq, %arg1, %c0_i32 : i32
    %1 = arith.extui %0 : i1 to i32
    %c0_i32_0 = arith.constant 0 : i32
    %2 = arith.cmpi ne, %1, %c0_i32_0 : i32
    scf.if %2 {
      %cst_21 = arith.constant 0.000000e+00 : f32
      %51 = vector.broadcast %cst_21 : f32 to vector<8x128xf32>
      %c0_22 = arith.constant 0 : index
      %c0_23 = arith.constant 0 : index
      %52 = vector.load %arg5[%c0_22, %c0_23] : memref<8x128xf32, #tpu.memory_space<vmem>>, vector<8x128xf32>
      tpu.vector_store %arg5[%c0_22, %c0_23], %51 {strides = array<i32>} : memref<8x128xf32, #tpu.memory_space<vmem>>, vector<8x128xf32>,
    } else {
    }
    %c0 = arith.constant 0 : index
    %c0_1 = arith.constant 0 : index
    %3 = vector.load %arg2[%c0, %c0_1] : memref<16x128xf32, #tpu.memory_space<vmem>>, vector<16x128xf32>
    %cst = arith.constant 5.000000e-01 : f32
    %4 = vector.broadcast %cst : f32 to vector<16x128xf32>
    %5 = arith.mulf %3, %4 : vector<16x128xf32>
    %c0_2 = arith.constant 0 : index
    %c0_3 = arith.constant 0 : index
    %6 = vector.load %arg3[%c0_2, %c0_3] : memref<16x128xf32, #tpu.memory_space<vmem>>, vector<16x128xf32>
    %cst_4 = arith.constant 5.000000e-01 : f32
    %7 = vector.broadcast %cst_4 : f32 to vector<16x128xf32>
    %8 = arith.mulf %6, %7 : vector<16x128xf32>
    %cst_5 = arith.constant dense<0xFF800000> : vector<16xf32>
    %9 = vector.multi_reduction <maximumf>, %5, %cst_5 [1] : vector<16x128xf32> to vector<16xf32>
    %10 = vector.shape_cast %9 : vector<16xf32> to vector<16x1xf32>
    %11 = vector.broadcast %10 : vector<16x1xf32> to vector<16x128xf32>
    %12 = arith.subf %5, %11 : vector<16x128xf32>
    %13 = math.exp %12 : vector<16x128xf32>
    %cst_6 = arith.constant dense<0.000000e+00> : vector<16xf32>
    %14 = vector.multi_reduction <add>, %13, %cst_6 [1] : vector<16x128xf32> to vector<16xf32>
    %15 = vector.shape_cast %14 : vector<16xf32> to vector<16x1xf32>
    %cst_7 = arith.constant 1.000000e+00 : f32
    %16 = vector.broadcast %cst_7 : f32 to vector<16x1xf32>
    %17 = arith.divf %16, %15 : vector<16x1xf32>
    %18 = vector.broadcast %17 : vector<16x1xf32> to vector<16x128xf32>
    %19 = arith.mulf %13, %18 : vector<16x128xf32>
    %cst_8 = arith.constant 1.000000e-10 : f32
    %20 = vector.broadcast %cst_8 : f32 to vector<16x128xf32>
    %21 = arith.addf %19, %20 : vector<16x128xf32>
    %cst_9 = arith.constant dense<0xFF800000> : vector<16xf32>
    %22 = vector.multi_reduction <maximumf>, %8, %cst_9 [1] : vector<16x128xf32> to vector<16xf32>
    %23 = vector.shape_cast %22 : vector<16xf32> to vector<16x1xf32>
    %24 = vector.broadcast %23 : vector<16x1xf32> to vector<16x128xf32>
    %25 = arith.subf %8, %24 : vector<16x128xf32>
    %26 = math.exp %25 : vector<16x128xf32>
    %cst_10 = arith.constant dense<0.000000e+00> : vector<16xf32>
    %27 = vector.multi_reduction <add>, %26, %cst_10 [1] : vector<16x128xf32> to vector<16xf32>
    %28 = vector.shape_cast %27 : vector<16xf32> to vector<16x1xf32>
    %cst_11 = arith.constant 1.000000e+00 : f32
    %29 = vector.broadcast %cst_11 : f32 to vector<16x1xf32>
    %30 = arith.divf %29, %28 : vector<16x1xf32>
    %31 = vector.broadcast %30 : vector<16x1xf32> to vector<16x128xf32>
    %32 = arith.mulf %26, %31 : vector<16x128xf32>
    %cst_12 = arith.constant 1.000000e-10 : f32
    %33 = vector.broadcast %cst_12 : f32 to vector<16x128xf32>
    %34 = arith.addf %32, %33 : vector<16x128xf32>
    %35 = arith.addf %21, %34 : vector<16x128xf32>
    %cst_13 = arith.constant 5.000000e-01 : f32
    %36 = vector.broadcast %cst_13 : f32 to vector<16x128xf32>
    %37 = arith.mulf %36, %35 : vector<16x128xf32>
    %38 = arith.mulf %21, %34 : vector<16x128xf32>
    %39 = math.rsqrt %38 : vector<16x128xf32>
    %40 = arith.mulf %37, %39 : vector<16x128xf32>
    %41 = math.log %40 : vector<16x128xf32>
    %42 = arith.mulf %37, %41 : vector<16x128xf32>
    %c0_14 = arith.constant 0 : index
    %c0_15 = arith.constant 0 : index
    %43 = vector.load %arg5[%c0_14, %c0_15] : memref<8x128xf32, #tpu.memory_space<vmem>>, vector<8x128xf32>
    %44 = vector.shape_cast %42 : vector<16x128xf32> to vector<2x8x128xf32>
    %cst_16 = arith.constant dense<0.000000e+00> : vector<8x128xf32>
    %45 = vector.multi_reduction <add>, %44, %cst_16 [0] : vector<2x8x128xf32> to vector<8x128xf32>
    %46 = arith.addf %43, %45 : vector<8x128xf32>
    %c0_17 = arith.constant 0 : index
    %c0_18 = arith.constant 0 : index
    %47 = vector.load %arg5[%c0_17, %c0_18] : memref<8x128xf32, #tpu.memory_space<vmem>>, vector<8x128xf32>
    tpu.vector_store %arg5[%c0_17, %c0_18], %46 {strides = array<i32>} : memref<8x128xf32, #tpu.memory_space<vmem>>, vector<8x128xf32>,
    %c0_i32_19 = arith.constant 0 : i32
    %48 = arith.cmpi eq, %arg1, %c0_i32_19 : i32
    %49 = arith.extui %48 : i1 to i32
    %c0_i32_20 = arith.constant 0 : i32
    %50 = arith.cmpi ne, %49, %c0_i32_20 : i32
    scf.if %50 {
      %c0_21 = arith.constant 0 : index
      %c0_22 = arith.constant 0 : index
      %51 = vector.load %arg5[%c0_21, %c0_22] : memref<8x128xf32, #tpu.memory_space<vmem>>, vector<8x128xf32>
      %52 = vector.shape_cast %51 : vector<8x128xf32> to vector<1x8x128xf32>
      %cst_23 = arith.constant dense<0.000000e+00> : vector<1xf32>
      %53 = vector.multi_reduction <add>, %52, %cst_23 [1, 2] : vector<1x8x128xf32> to vector<1xf32>
      %54 = vector.shape_cast %53 : vector<1xf32> to vector<1x1x1xf32>
      %55 = vector.extract %54[0, 0, 0] : f32 from vector<1x1x1xf32>
      %56 = vector.broadcast %55 : f32 to vector<1x1xf32>
      %cst_24 = arith.constant 2.500000e-01 : f32
      %57 = vector.broadcast %cst_24 : f32 to vector<1x1xf32>
      %58 = arith.mulf %56, %57 : vector<1x1xf32>
      %c0_25 = arith.constant 0 : index
      %c0_26 = arith.constant 0 : index
      %59 = vector.load %arg4[%c0_25, %c0_26] : memref<1x1xf32, #tpu.memory_space<vmem>>, vector<1x1xf32>
      tpu.vector_store %arg4[%c0_25, %c0_26], %58 {strides = array<i32>} : memref<1x1xf32, #tpu.memory_space<vmem>>, vector<1x1xf32>,
    } else {
    }
    return
  }
  func.func @transform_0(%arg0: i32, %arg1: i32) -> (i32, i32) {
    %c1_i32 = arith.constant 1 : i32
    %0 = arith.muli %arg0, %c1_i32 : i32
    %1 = arith.addi %0, %arg1 : i32
    %c0_i32 = arith.constant 0 : i32
    %2 = arith.minsi %1, %c0_i32 : i32
    %c0_i32_0 = arith.constant 0 : i32
    %c0_i32_1 = arith.constant 0 : i32
    return %2, %c0_i32_0 : i32, i32
  }
  func.func @transform_1(%arg0: i32, %arg1: i32) -> (i32, i32) {
    %c1_i32 = arith.constant 1 : i32
    %0 = arith.muli %arg0, %c1_i32 : i32
    %1 = arith.addi %0, %arg1 : i32
    %c0_i32 = arith.constant 0 : i32
    %2 = arith.minsi %1, %c0_i32 : i32
    %c0_i32_0 = arith.constant 0 : i32
    %c0_i32_1 = arith.constant 0 : i32
    return %2, %c0_i32_0 : i32, i32
  }
  func.func @transform_2(%arg0: i32, %arg1: i32) -> (i32, i32) {
    %c0_i32 = arith.constant 0 : i32
    %c0_i32_0 = arith.constant 0 : i32
    return %arg0, %c0_i32 : i32, i32
  }
}

</mosaic_0001>

<bundles_post_ra>
// kernel: tpu_custom_call.1
= control target key start
LH: loop header
LB: loop body
LE: loop exit
PB: predicated region body
PF: predicated region fallthrough
CT: control target
= control target key end

     0   :  { %7 = vsyncpa [#allocation4], 0  ;;  %s300_s0 = inlined_call_operand.hbm [shape: f32[16,128], index: 0, kind: input, shape index: {}]   ;;  %s301_s1 = inlined_call_operand.hbm [shape: f32[16,128], index: 1, kind: input, shape index: {}]   ;;  %s302_s2 = inlined_call_operand.hbm [shape: f32[1,1], index: 2, kind: output, shape index: {}]  }
   0x1   :  { %8 = vsyncpa [#allocation7], 0 }
   0x2   :  { %9 = vsyncpa [#allocation5], 0  ;;  %s271_s9 = smov [#allocation3]  }
   0x3   :  { %s21_s10 = sshll.u32 %s271_s9, 4  ;;  %s22_s10 = int_to_ptr.vmem [resolvable:$true] %s21_s10 }
   0x4   :  { %s213_s11 = scalar_lea.vmem %s22_s10, 256  ;;  %p218_p1 = scmp.lt.s32.totalorder %s22_s10, %s22_s10 }
   0x5   :  { %p214_p0 = scmp.ne.s32.totalorder %s22_s10, %s213_s11  ;;  %p219_p2 = scmp.lt.s32.totalorder %s213_s11, %s213_s11 }
   0x7   :  { %p220_p3 = por %p219_p2, %p218_p1 }
   0x9   :  { %p221_p4 = pnand %p220_p3, %p214_p0 }
   0xb   :  { %224 = shalt.err (!%p221_p4)
}
   0xc   :  { %s272_s12 = smov 128   ;;  %s273_s13 = smov 8  }
   0xd   :  { %27 = dma.hbm_to_vmem [thread:$0]  %s300_s0, 256, %s22_s10, [#allocation4], %s272_s12, %s272_s12, %s273_s13  }
   0xe   :  { %s274_s16 = smov [#allocation6]  }
   0xf   :  { %s39_s17 = sshll.u32 %s274_s16, 4  ;;  %s40_s17 = int_to_ptr.vmem [resolvable:$true] %s39_s17 }
  0x10   :  { %s233_s18 = scalar_lea.vmem %s40_s17, 256  ;;  %p238_p6 = scmp.lt.s32.totalorder %s40_s17, %s40_s17 }
  0x11   :  { %p234_p5 = scmp.ne.s32.totalorder %s40_s17, %s233_s18  ;;  %p239_p7 = scmp.lt.s32.totalorder %s233_s18, %s233_s18 }
  0x13   :  { %p240_p8 = por %p239_p7, %p238_p6 }
  0x15   :  { %p241_p9 = pnand %p240_p8, %p234_p5 }
  0x17   :  { %244 = shalt.err (!%p241_p9)
}
  0x18   :  { %45 = dma.hbm_to_vmem [thread:$0]  %s301_s1, 256, %s40_s17, [#allocation7], %s272_s12, %s272_s12, %s273_s13  }
  0x19   :  { %265 = dma.done.wait [#allocation4], 256  }
  0x1a   :  { %266 = vsyncadd [#allocation4], 4294967040 }
  0x1b   :  { %267 = dma.done.wait [#allocation7], 256  }
  0x1c   :  { %268 = vsyncadd [#allocation7], 4294967040  ;;  %v65_v0 = vld [vmem:[#allocation3] sm:$0xff]  ;;  %v69_v1 = vld [vmem:[#allocation6] sm:$0xff]  ;;  %s275_s0 = smov [#allocation8]   ;;  %vm152_vm0 = vcmask 0  }
  0x1d   :  { %v66_v2 = vld [vmem:[#allocation3 + $0x8] sm:$0xff]  ;;  %v67_v3 = vmul.f32 0.5, %v65_v0  ;;  %v71_v4 = vmul.f32 0.5, %v69_v1  ;;  %v70_v5 = vld [vmem:[#allocation6 + $0x8] sm:$0xff]  ;;  %s160_s1 = sshll.u32 %s275_s0, 4  ;;  %s161_s1 = int_to_ptr.vmem [resolvable:$true] %s160_s1 }
  0x1e   :  { %v68_v6 = vmul.f32 0.5, %v66_v2  ;;  %v72_v7 = vmul.f32 0.5, %v70_v5  ;;  %s245_s22 = scalar_lea.vmem %s161_s1, 16  ;;  %s249_s23 = scalar_lea.vmem %s161_s1, 32 }
  0x1f   :  { %73 = vmax.xlane.f32.xlu0 %v67_v3  ;;  %95 = vmax.xlane.f32.xlu1 %v71_v4  ;;  %p246_p10 = scmp.ne.s32.totalorder %s161_s1, %s245_s22  ;;  %p250_p11 = scmp.lt.s32.totalorder %s161_s1, %s161_s1 }
  0x20   :  { %p251_p12 = scmp.lt.s32.totalorder %s249_s23, %s245_s22 }
  0x22   :  { %p252_p13 = por %p251_p12, %p250_p11 }
  0x23   :  { %75 = vmax.xlane.f32.xlu0 %v68_v6  ;;  %97 = vmax.xlane.f32.xlu1 %v72_v7 }
  0x24   :  { %p253_p0 = pnand %p252_p13, %p246_p10 }
  0xa8   :  { %v74_v8 = vpop.xlane.xlu0 %73  ;;  %v96_v9 = vpop.xlane.xlu1 %95 }
  0xa9   :  { %v77_v10 = vsub.f32 %v67_v3, %v74_v8  ;;  %v99_v11 = vsub.f32 %v71_v4, %v96_v9 }
  0xab   :  { %v79_v12 = vmul.f32 1.442695, %v77_v10  ;;  %v101_v13 = vmul.f32 1.442695, %v99_v11 }
  0xac   :  { %v76_v14 = vpop.xlane.xlu0 %75  ;;  %v98_v15 = vpop.xlane.xlu1 %97 }
  0xad   :  { %181 = vpow2.f32 %v79_v12  ;;  %v78_v16 = vsub.f32 %v68_v6, %v76_v14  ;;  %v100_v17 = vsub.f32 %v72_v7, %v98_v15 }
  0xae   :  { %183 = vpow2.f32 %v101_v13 }
  0xaf   :  { %v81_v18 = vmul.f32 1.442695, %v78_v16  ;;  %v103_v19 = vmul.f32 1.442695, %v100_v17 }
  0xb1   :  { %185 = vpow2.f32 %v81_v18 }
  0xb2   :  { %187 = vpow2.f32 %v103_v19 }
  0xba   :  { %v182_v20 = vpop.eup %181 }
  0xbb   :  { %83 = vadd.xlane.f32.xlu0 %v182_v20  ;;  %v184_v21 = vpop.eup %183 }
  0xbe   :  { %v186_v22 = vpop.eup %185 }
  0xbf   :  { %105 = vadd.xlane.f32.xlu0 %v184_v21  ;;  %85 = vadd.xlane.f32.xlu1 %v186_v22  ;;  %v188_v23 = vpop.eup %187 }
  0xc3   :  { %107 = vadd.xlane.f32.xlu1 %v188_v23 }
 0x144   :  { %v84_v24 = vpop.xlane.xlu0 %83 }
 0x145   :  { %189 = vrcp.f32 %v84_v24 }
 0x148   :  { %v86_v25 = vpop.xlane.xlu1 %85  ;;  %v106_v26 = vpop.xlane.xlu0 %105 }
 0x149   :  { %191 = vrcp.f32 %v86_v25 }
 0x14a   :  { %193 = vrcp.f32 %v106_v26 }
 0x14c   :  { %v108_v27 = vpop.xlane.xlu1 %107 }
 0x14d   :  { %195 = vrcp.f32 %v108_v27 }
 0x152   :  { %v190_v28 = vpop.eup %189 }
 0x153   :  { %v91_v30 = vmul.f32 %v190_v28, %v182_v20 }
 0x155   :  { %v93_v35 = vadd.f32 1e-10, %v91_v30 }
 0x156   :  { %v192_v29 = vpop.eup %191 }
 0x157   :  { %v194_v31 = vpop.eup %193  ;;  %v92_v33 = vmul.f32 %v192_v29, %v186_v22 }
 0x158   :  { %v113_v32 = vmul.f32 %v194_v31, %v184_v21 }
 0x159   :  { %v94_v39 = vadd.f32 1e-10, %v92_v33 }
 0x15a   :  { %v196_v34 = vpop.eup %195  ;;  %v115_v36 = vadd.f32 1e-10, %v113_v32 }
 0x15b   :  { %v114_v37 = vmul.f32 %v196_v34, %v188_v23 }
 0x15c   :  { %v121_v38 = vmul.f32 %v115_v36, %v93_v35  ;;  %v117_v42 = vadd.f32 %v115_v36, %v93_v35 }
 0x15d   :  { %v116_v40 = vadd.f32 1e-10, %v114_v37 }
 0x15e   :  { %197 = vrsqrt.f32 %v121_v38  ;;  %v119_v44 = vmul.f32 0.5, %v117_v42 }
 0x15f   :  { %v122_v41 = vmul.f32 %v116_v40, %v94_v39  ;;  %v118_v43 = vadd.f32 %v116_v40, %v94_v39 }
 0x161   :  { %199 = vrsqrt.f32 %v122_v41  ;;  %v120_v47 = vmul.f32 0.5, %v118_v43 }
 0x16b   :  { %v198_v45 = vpop.eup %197 }
 0x16c   :  { %v125_v46 = vmul.f32 %v198_v45, %v119_v44 }
 0x16e   :  { %v200_v48 = vpop.eup %199  ;;  %201 = vlog2.f32 %v125_v46 }
 0x16f   :  { %v126_v49 = vmul.f32 %v200_v48, %v120_v47 }
 0x171   :  { %203 = vlog2.f32 %v126_v49 }
 0x17b   :  { %v202_v50 = vpop.eup %201 }
 0x17c   :  { %v128_v51 = vmul.f32 0.6931472, %v202_v50 }
 0x17e   :  { %v204_v52 = vpop.eup %203  ;;  %v131_v54 = vmul.f32 %v128_v51, %v119_v44 }
 0x17f   :  { %v130_v53 = vmul.f32 0.6931472, %v204_v52 }
 0x181   :  { %v132_v55 = vmul.f32 %v130_v53, %v120_v47 }
 0x183   :  { %v134_v56 = vadd.f32 %v132_v55, %v131_v54 }
 0x185   :  { %141 = vadd.xlane.f32.xlu0 %v134_v56 }
 0x20e   :  { %v142_v57 = vpop.xlane.xlu0 %141 }
 0x20f   :  { %v143_v58 = vrot.slane %v142_v57, 4 }
 0x211   :  { %v144_v59 = vadd.f32 %v143_v58, %v142_v57 }
 0x213   :  { %v145_v60 = vrot.slane %v144_v59, 2 }
 0x215   :  { %v146_v61 = vadd.f32 %v145_v60, %v144_v59 }
 0x217   :  { %v147_v62 = vrot.slane %v146_v61, 1 }
 0x219   :  { %v148_v63 = vadd.f32 %v147_v62, %v146_v61 }
 0x21b   :  { %174 = vpush %v148_v63 }
 0x24c   :  { %s175_s21 = spop %174 }
 0x24d   :  { %v150_v0 = vstv %s175_s21 }
 0x24e   :  { %v151_v1 = vmul.f32 0.25, %v150_v0 }
 0x250   :  { %153 = vst.msk [vmem:[#allocation8] sm:$0x1] %vm152_vm0, %v151_v1 }
 0x251   :  { %256 = shalt.err (!%p253_p0)
}
 0x252   :  { %163 = dma.vmem_to_hbm [thread:$0]  %s161_s1, 16, %s302_s2, [#allocation5]  }
 0x253   :  { %269 = dma.done.wait [#allocation5], 16  }
 0x254   :  { %270 = vsyncadd [#allocation5], 4294967280 }
 0x255   :  { %167 = vsyncpa [#allocation4], 1 }
 0x256   :  { %168 = vsyncpa [#allocation7], 1 }
 0x257   :  { %169 = vsyncpa [#allocation5], 1 }

</bundles_post_ra>
